<compile_context>
chip_gen: v6e
topology: v6e:2x2x1
jax: 0.10.0
libtpu: 0.0.40
codegen_flags: <defaults>
</compile_context>

<pallas_src>
import jax
import jax.numpy as jnp
from jax.experimental import pallas as pl
from jax.experimental.pallas import tpu as pltpu


def _round_up(x, m):
    return (x + m - 1) // m * m


def _cdiv(a, b):
    return -(-a // b)


def pack_params(p, units, thetas_dim, past_seq_len, future_seq_len, pack):
    """Pack all weights/biases (block-diag replicated `pack` times, theta
    folded into the head) into one lane-dense (rows, width) f32 slab.

    Every segment starts on an 8-row boundary; all padding is zero so it is
    mathematically inert.  Returns (slab, offsets, width).
    """
    out_cols = past_seq_len + future_seq_len
    width = _round_up(max(pack * units, pack * out_cols), 128)

    def bdiag(w):
        r, c = w.shape
        m = jnp.zeros((pack * r, pack * c), jnp.float32)
        for i in range(pack):
            m = m.at[i * r:(i + 1) * r, i * c:(i + 1) * c].set(w)
        return m

    # Fold theta projections into the backcast/forecast heads (no nonlinearity
    # in between, so this is exact up to f32 rounding).
    w_fold = jnp.concatenate([p["wtb"] @ p["wbc"],
                              p["wtf"] @ p["wfc"]], axis=1)      # (units, out_cols)
    b_fold = jnp.concatenate([p["bbc"], p["bfc"]], axis=1)       # (1, out_cols)

    segs = []
    offsets = {}
    row = 0

    def add(name, mat, rows=None):
        nonlocal row
        r, c = mat.shape
        r_alloc = _round_up(rows if rows is not None else r, 8)
        blk = jnp.zeros((r_alloc, width), jnp.float32).at[:r, :c].set(mat)
        offsets[name] = row
        segs.append(blk)
        row += r_alloc

    add("w1", bdiag(p["w1"]))                       # (pack*past, pack*units)
    add("b1", jnp.tile(p["b1"], (1, pack)))
    add("w2", bdiag(p["w2"]), rows=width)
    add("b2", jnp.tile(p["b2"], (1, pack)))
    add("w3", bdiag(p["w3"]), rows=width)
    add("b3", jnp.tile(p["b3"], (1, pack)))
    add("w4", bdiag(p["w4"]), rows=width)
    add("b4", jnp.tile(p["b4"], (1, pack)))
    add("wh", bdiag(w_fold), rows=width)            # folded head
    add("bh", jnp.tile(b_fold, (1, pack)))

    slab = jnp.concatenate(segs, axis=0)
    return slab, offsets, width


def _make_kernel(off, in_cols, width, out_pack_cols):
    def kernel(x_ref, slab_ref, out_ref):
        x = x_ref[...]                                            # (Bt, pack*past)

        def lin_relu(h, w_off, w_rows, b_off):
            w = slab_ref[w_off:w_off + w_rows, :]                 # static slice
            b = slab_ref[b_off:b_off + 1, :]
            return jnp.maximum(
                jnp.dot(h, w, preferred_element_type=jnp.float32) + b, 0.0)

        # fc1..fc4 with ReLU; block-diagonal packing keeps lanes independent.
        h = lin_relu(x, off["w1"], in_cols, off["b1"])
        h = lin_relu(h, off["w2"], width, off["b2"])
        h = lin_relu(h, off["w3"], width, off["b3"])
        h = lin_relu(h, off["w4"], width, off["b4"])

        # Folded (theta -> backcast|forecast) head in a single matmul.
        wh = slab_ref[off["wh"]:off["wh"] + width, :]
        bh = slab_ref[off["bh"]:off["bh"] + 1, :]
        out = jnp.dot(h, wh, preferred_element_type=jnp.float32) + bh

        out_ref[...] = out[:, :out_pack_cols]

    return kernel


def generic_block_forward(x, params, *, units, thetas_dim,
                          past_seq_len, future_seq_len,
                          batch_tile=1024, pack=4):
    """x: (B, past_seq_len) f32 -> (backcast (B, past), forecast (B, future))."""
    B = x.shape[0]
    out_cols = past_seq_len + future_seq_len

    slab, off, width = pack_params(params, units, thetas_dim,
                                   past_seq_len, future_seq_len, pack)

    in_cols = pack * past_seq_len
    out_pack = pack * out_cols

    # Packed-batch tiling: Bt is a multiple of 8, capped so that large batches
    # always give >= 2 grid steps (v7x megacore), while the weight slab stays
    # VMEM-resident across the whole grid.
    G = _cdiv(B, pack)                                   # packed rows needed
    Bt = min(_round_up(batch_tile, 8), _round_up(_cdiv(G, 2), 8))
    Gp = _round_up(G, Bt)
    Bp = Gp * pack
    if Bp != B:
        x = jnp.pad(x, ((0, Bp - B), (0, 0)))
    xp = x.reshape(Gp, in_cols)                          # free row-major view

    kernel = _make_kernel(off, in_cols, width, out_pack)

    flops = 2 * Bp * (past_seq_len * units + 3 * units * units
                      + units * out_cols)
    bytes_accessed = Bp * (past_seq_len + out_cols) * 4 + slab.size * 4

    out = pl.pallas_call(
        kernel,
        out_shape=jax.ShapeDtypeStruct((Gp, out_pack), jnp.float32),
        grid=(Gp // Bt,),
        in_specs=[
            pl.BlockSpec((Bt, in_cols), lambda i: (i, 0)),   # packed activations
            pl.BlockSpec(slab.shape, lambda i: (0, 0)),      # resident weights
        ],
        out_specs=pl.BlockSpec((Bt, out_pack), lambda i: (i, 0)),
        compiler_params=pltpu.CompilerParams(
            dimension_semantics=("parallel",),
            vmem_limit_bytes=32 * 1024 * 1024),
        cost_estimate=pl.CostEstimate(flops=flops, transcendentals=0,
                                      bytes_accessed=bytes_accessed),
    )(xp, slab)

    # Un-pack: (Gp, pack*out_cols) -> (B, out_cols), then split heads.
    out = out[:G].reshape(G * pack, out_cols)[:B]
    backcast = out[:, :past_seq_len]
    forecast = out[:, past_seq_len:]
    return backcast, forecast


def init_params(key, units, thetas_dim, past_seq_len, future_seq_len):
    """Deterministic synthetic init. Weights are (in, out); biases are (1, out)."""
    ks = jax.random.split(key, 16)

    def lin(kw, kb, fan_in, fan_out, bias=True):
        bound = 1.0 / jnp.sqrt(jnp.float32(fan_in))
        w = jax.random.uniform(kw, (fan_in, fan_out), jnp.float32, -bound, bound)
        b = (jax.random.uniform(kb, (1, fan_out), jnp.float32, -bound, bound)
             if bias else None)
        return w, b

    w1, b1 = lin(ks[0], ks[1], past_seq_len, units)
    w2, b2 = lin(ks[2], ks[3], units, units)
    w3, b3 = lin(ks[4], ks[5], units, units)
    w4, b4 = lin(ks[6], ks[7], units, units)
    wtb, _ = lin(ks[8], ks[9], units, thetas_dim, bias=False)
    wtf, _ = lin(ks[10], ks[11], units, thetas_dim, bias=False)
    wbc, bbc = lin(ks[12], ks[13], thetas_dim, past_seq_len)
    wfc, bfc = lin(ks[14], ks[15], thetas_dim, future_seq_len)

    return dict(w1=w1, b1=b1, w2=w2, b2=b2, w3=w3, b3=b3, w4=w4, b4=b4,
                wtb=wtb, wtf=wtf, wbc=wbc, bbc=bbc, wfc=wfc, bfc=bfc)


def reference_forward(x, p):
    """Pure-JAX reference matching the PyTorch GenericBlock semantics."""
    h = jax.nn.relu(x @ p["w1"] + p["b1"])
    h = jax.nn.relu(h @ p["w2"] + p["b2"])
    h = jax.nn.relu(h @ p["w3"] + p["b3"])
    h = jax.nn.relu(h @ p["w4"] + p["b4"])
    theta_b = h @ p["wtb"]
    theta_f = h @ p["wtf"]
    backcast = theta_b @ p["wbc"] + p["bbc"]
    forecast = theta_f @ p["wfc"] + p["bfc"]
    return backcast, forecast


if __name__ == "__main__":
    # GenericBlock default hyperparameters
    units = 32
    thetas_dim = 8
    past_seq_len = 10
    future_seq_len = 5
    batch = 8

    key = jax.random.PRNGKey(0)
    k_x, k_p = jax.random.split(key)

    x = jax.random.normal(k_x, (batch, past_seq_len), dtype=jnp.float32)
    params = init_params(k_p, units, thetas_dim, past_seq_len, future_seq_len)

    backcast, forecast = generic_block_forward(
        x, params, units=units, thetas_dim=thetas_dim,
        past_seq_len=past_seq_len, future_seq_len=future_seq_len)
    backcast = jax.block_until_ready(backcast)
    forecast = jax.block_until_ready(forecast)

    ref_b, ref_f = reference_forward(x, params)
    assert backcast.shape == (batch, past_seq_len)
    assert forecast.shape == (batch, future_seq_len)
    assert jnp.allclose(backcast, ref_b, atol=1e-5, rtol=1e-5)
    assert jnp.allclose(forecast, ref_f, atol=1e-5, rtol=1e-5)

    print("KERNEL_OK")
</pallas_src>

<mosaic_0001>
module attributes {stable_mosaic.version = 11 : i64} {
  func.func @kernel(%arg0: i32, %arg1: memref<8x40xf32, #tpu.memory_space<vmem>>, %arg2: memref<592x128xf32, #tpu.memory_space<vmem>>, %arg3: memref<8x60xf32, #tpu.memory_space<vmem>>) attributes {dimension_semantics = [#tpu.dimension_semantics<parallel>], iteration_bounds = array<i64: 1>, scalar_prefetch = 0 : i64, scratch_operands = 0 : i64, tpu.core_type = #tpu.core_type<tc>, window_params = [{transform_indices = @transform_0, window_bounds = array<i64: 8, 40>}, {pipeline_mode = #tpu.pipeline_mode<synchronous>, transform_indices = @transform_1, window_bounds = array<i64: 592, 128>}, {transform_indices = @transform_2, window_bounds = array<i64: 8, 60>}]} {
    %c0 = arith.constant 0 : index
    %c0_0 = arith.constant 0 : index
    %0 = vector.load %arg1[%c0, %c0_0] : memref<8x40xf32, #tpu.memory_space<vmem>>, vector<8x40xf32>
    %c0_1 = arith.constant 0 : index
    %c0_2 = arith.constant 0 : index
    %1 = vector.load %arg2[%c0_1, %c0_2] : memref<592x128xf32, #tpu.memory_space<vmem>>, vector<40x128xf32>
    %c40 = arith.constant 40 : index
    %c0_3 = arith.constant 0 : index
    %2 = vector.load %arg2[%c40, %c0_3] : memref<592x128xf32, #tpu.memory_space<vmem>>, vector<1x128xf32>
    %cst = arith.constant dense<0.000000e+00> : vector<8x128xf32>
    %3 = tpu.matmul %0, %1, %cst {dimension_numbers = #tpu.dot_dimension_numbers<[1], [0], [0], [1], [0, 0, 1, 1], [], []>} : vector<8x40xf32>, vector<40x128xf32>, vector<8x128xf32> -> vector<8x128xf32>
    %4 = vector.broadcast %2 : vector<1x128xf32> to vector<8x128xf32>
    %5 = arith.addf %3, %4 : vector<8x128xf32>
    %cst_4 = arith.constant 0.000000e+00 : f32
    %6 = vector.broadcast %cst_4 : f32 to vector<8x128xf32>
    %7 = arith.maximumf %5, %6 : vector<8x128xf32>
    %c48 = arith.constant 48 : index
    %c0_5 = arith.constant 0 : index
    %8 = vector.load %arg2[%c48, %c0_5] : memref<592x128xf32, #tpu.memory_space<vmem>>, vector<128x128xf32>
    %c176 = arith.constant 176 : index
    %c0_6 = arith.constant 0 : index
    %9 = vector.load %arg2[%c176, %c0_6] : memref<592x128xf32, #tpu.memory_space<vmem>>, vector<1x128xf32>
    %cst_7 = arith.constant dense<0.000000e+00> : vector<8x128xf32>
    %10 = tpu.matmul %7, %8, %cst_7 {dimension_numbers = #tpu.dot_dimension_numbers<[1], [0], [0], [1], [0, 0, 1, 1], [], []>} : vector<8x128xf32>, vector<128x128xf32>, vector<8x128xf32> -> vector<8x128xf32>
    %11 = vector.broadcast %9 : vector<1x128xf32> to vector<8x128xf32>
    %12 = arith.addf %10, %11 : vector<8x128xf32>
    %cst_8 = arith.constant 0.000000e+00 : f32
    %13 = vector.broadcast %cst_8 : f32 to vector<8x128xf32>
    %14 = arith.maximumf %12, %13 : vector<8x128xf32>
    %c184 = arith.constant 184 : index
    %c0_9 = arith.constant 0 : index
    %15 = vector.load %arg2[%c184, %c0_9] : memref<592x128xf32, #tpu.memory_space<vmem>>, vector<128x128xf32>
    %c312 = arith.constant 312 : index
    %c0_10 = arith.constant 0 : index
    %16 = vector.load %arg2[%c312, %c0_10] : memref<592x128xf32, #tpu.memory_space<vmem>>, vector<1x128xf32>
    %cst_11 = arith.constant dense<0.000000e+00> : vector<8x128xf32>
    %17 = tpu.matmul %14, %15, %cst_11 {dimension_numbers = #tpu.dot_dimension_numbers<[1], [0], [0], [1], [0, 0, 1, 1], [], []>} : vector<8x128xf32>, vector<128x128xf32>, vector<8x128xf32> -> vector<8x128xf32>
    %18 = vector.broadcast %16 : vector<1x128xf32> to vector<8x128xf32>
    %19 = arith.addf %17, %18 : vector<8x128xf32>
    %cst_12 = arith.constant 0.000000e+00 : f32
    %20 = vector.broadcast %cst_12 : f32 to vector<8x128xf32>
    %21 = arith.maximumf %19, %20 : vector<8x128xf32>
    %c320 = arith.constant 320 : index
    %c0_13 = arith.constant 0 : index
    %22 = vector.load %arg2[%c320, %c0_13] : memref<592x128xf32, #tpu.memory_space<vmem>>, vector<128x128xf32>
    %c448 = arith.constant 448 : index
    %c0_14 = arith.constant 0 : index
    %23 = vector.load %arg2[%c448, %c0_14] : memref<592x128xf32, #tpu.memory_space<vmem>>, vector<1x128xf32>
    %cst_15 = arith.constant dense<0.000000e+00> : vector<8x128xf32>
    %24 = tpu.matmul %21, %22, %cst_15 {dimension_numbers = #tpu.dot_dimension_numbers<[1], [0], [0], [1], [0, 0, 1, 1], [], []>} : vector<8x128xf32>, vector<128x128xf32>, vector<8x128xf32> -> vector<8x128xf32>
    %25 = vector.broadcast %23 : vector<1x128xf32> to vector<8x128xf32>
    %26 = arith.addf %24, %25 : vector<8x128xf32>
    %cst_16 = arith.constant 0.000000e+00 : f32
    %27 = vector.broadcast %cst_16 : f32 to vector<8x128xf32>
    %28 = arith.maximumf %26, %27 : vector<8x128xf32>
    %c456 = arith.constant 456 : index
    %c0_17 = arith.constant 0 : index
    %29 = vector.load %arg2[%c456, %c0_17] : memref<592x128xf32, #tpu.memory_space<vmem>>, vector<128x128xf32>
    %c584 = arith.constant 584 : index
    %c0_18 = arith.constant 0 : index
    %30 = vector.load %arg2[%c584, %c0_18] : memref<592x128xf32, #tpu.memory_space<vmem>>, vector<1x128xf32>
    %cst_19 = arith.constant dense<0.000000e+00> : vector<8x128xf32>
    %31 = tpu.matmul %28, %29, %cst_19 {dimension_numbers = #tpu.dot_dimension_numbers<[1], [0], [0], [1], [0, 0, 1, 1], [], []>} : vector<8x128xf32>, vector<128x128xf32>, vector<8x128xf32> -> vector<8x128xf32>
    %32 = vector.broadcast %30 : vector<1x128xf32> to vector<8x128xf32>
    %33 = arith.addf %31, %32 : vector<8x128xf32>
    %34 = vector.extract_strided_slice %33 {offsets = [0, 0], sizes = [8, 60], strides = [1, 1]} : vector<8x128xf32> to vector<8x60xf32>
    %c0_20 = arith.constant 0 : index
    %c0_21 = arith.constant 0 : index
    %35 = vector.load %arg3[%c0_20, %c0_21] : memref<8x60xf32, #tpu.memory_space<vmem>>, vector<8x60xf32>
    tpu.vector_store %arg3[%c0_20, %c0_21], %34 {strides = array<i32>} : memref<8x60xf32, #tpu.memory_space<vmem>>, vector<8x60xf32>,
    return
  }
  func.func @transform_0(%arg0: i32) -> (i32, i32) {
    %c0_i32 = arith.constant 0 : i32
    %c0_i32_0 = arith.constant 0 : i32
    return %arg0, %c0_i32 : i32, i32
  }
  func.func @transform_1(%arg0: i32) -> (i32, i32) {
    %c0_i32 = arith.constant 0 : i32
    %c0_i32_0 = arith.constant 0 : i32
    %c0_i32_1 = arith.constant 0 : i32
    return %c0_i32, %c0_i32_0 : i32, i32
  }
  func.func @transform_2(%arg0: i32) -> (i32, i32) {
    %c0_i32 = arith.constant 0 : i32
    %c0_i32_0 = arith.constant 0 : i32
    return %arg0, %c0_i32 : i32, i32
  }
}

</mosaic_0001>

<bundles_post_ra>
// kernel: tpu_custom_call.1
= control target key start
LH: loop header
LB: loop body
LE: loop exit
PB: predicated region body
PF: predicated region fallthrough
CT: control target
= control target key end

     0   :  { %7 = vsyncpa [#allocation3], 0  ;;  %s925_s0 = inlined_call_operand.hbm [shape: f32[8,40], index: 0, kind: input, shape index: {}]   ;;  %s926_s1 = inlined_call_operand.hbm [shape: f32[592,128], index: 1, kind: input, shape index: {}]   ;;  %s927_s2 = inlined_call_operand.hbm [shape: f32[8,60], index: 2, kind: output, shape index: {}]  }
   0x1   :  { %8 = vsyncpa [#allocation6], 0 }
   0x2   :  { %9 = vsyncpa [#allocation4], 0  ;;  %s815_s9 = smov [#allocation2]   ;;  %s816_s11 = smov [#allocation5]  }
   0x3   :  { %s16_s10 = sshll.u32 %s815_s9, 4  ;;  %s25_s12 = sshll.u32 %s816_s11, 4  ;;  %s17_s10 = int_to_ptr.vmem [resolvable:$true] %s16_s10  ;;  %s26_s12 = int_to_ptr.vmem [resolvable:$true] %s25_s12 }
   0x4   :  { %s757_s13 = scalar_lea.vmem %s17_s10, 128  ;;  %p762_p1 = scmp.lt.s32.totalorder %s17_s10, %s17_s10 }
   0x5   :  { %p758_p0 = scmp.ne.s32.totalorder %s17_s10, %s757_s13  ;;  %p763_p2 = scmp.lt.s32.totalorder %s757_s13, %s757_s13 }
   0x7   :  { %p764_p3 = por %p763_p2, %p762_p1 }
   0x9   :  { %p765_p4 = pnand %p764_p3, %p758_p0 }
   0xb   :  { %768 = shalt.err (!%p765_p4)
}
   0xc   :  { %19 = dma.hbm_to_vmem [thread:$0]  %s925_s0, 128, %s17_s10, [#allocation3]  }
   0xd   :  { %s777_s16 = scalar_lea.vmem %s26_s12, 9472  ;;  %p782_p6 = scmp.lt.s32.totalorder %s26_s12, %s26_s12 }
   0xe   :  { %p778_p5 = scmp.ne.s32.totalorder %s26_s12, %s777_s16  ;;  %p783_p7 = scmp.lt.s32.totalorder %s777_s16, %s777_s16 }
  0x10   :  { %p784_p8 = por %p783_p7, %p782_p6 }
  0x12   :  { %p785_p9 = pnand %p784_p8, %p778_p5 }
  0x14   :  { %788 = shalt.err (!%p785_p9)
}
  0x15   :  { %s817_s17 = smov 128   ;;  %s818_s18 = smov 8  }
  0x16   :  { %31 = dma.hbm_to_vmem [thread:$0]  %s926_s1, 9472, %s26_s12, [#allocation6], %s817_s17, %s817_s17, %s818_s18  }
  0x17   :  { %809 = dma.done.wait [#allocation3], 128  }
  0x18   :  { %810 = vsyncadd [#allocation3], 4294967168 }
  0x19   :  { %811 = dma.done.wait [#allocation6], 9472  }
  0x1a   :  { %812 = vsyncadd [#allocation6], 4294957824  ;;  %v819_v0 = vmov 0.0   ;;  %vm820_vm0 = vmmov 0   ;;  %v43_v1 = vld [vmem:[#allocation5 + $0x20] sm:$0xff]  ;;  %v42_v2 = vld [vmem:[#allocation5 + $0x18] sm:$0xff] }
  0x1b   :  { %589 = vmatprep.subr.mxu0 %v819_v0  ;;  %599 = vmatprep.mubr.msk.f32.mxu0 %vm820_vm0, %v819_v0  ;;  %v41_v3 = vld [vmem:[#allocation5 + $0x10] sm:$0xff]  ;;  %v139_v4 = vld [vmem:[#allocation5 + $0xa8] sm:$0xff]  ;;  %v138_v5 = vld [vmem:[#allocation5 + $0xa0] sm:$0xff]  ;;  %vm49_vm1 = vcmask 326656   ;;  %s821_s0 = smov [#allocation7]   ;;  %vm491_vm2 = vcmask 490496  }
  0x1c   :  { %602 = vmatprep.subr.mxu1 %v819_v0  ;;  %634 = vmatprep.mubr.msk.f32.mxu1 %vm820_vm0, %v819_v0  ;;  %v40_v6 = vld [vmem:[#allocation5 + $0x8] sm:$0xff]  ;;  %v137_v7 = vld [vmem:[#allocation5 + $0x98] sm:$0xff]  ;;  %v39_v8 = vld [vmem:[#allocation5] sm:$0xff]  ;;  %s499_s1 = sshll.u32 %s821_s0, 4  ;;  %s500_s1 = int_to_ptr.vmem [resolvable:$true] %s499_s1 }
  0x1d   :  { %590 = vmatpush3.msra.mxu0 %v43_v1  ;;  %603 = vmatpush3.msra.mxu1 %v139_v4  ;;  %v136_v9 = vld [vmem:[#allocation5 + $0x90] sm:$0xff]  ;;  %v38_v10 = vld [vmem:[#allocation2] sm:$0xff]  ;;  %v135_v11 = vld [vmem:[#allocation5 + $0x88] sm:$0xff]  ;;  %s789_s21 = scalar_lea.vmem %s500_s1, 128  ;;  %p794_p11 = scmp.lt.s32.totalorder %s500_s1, %s500_s1 }
  0x1e   :  { %591 = vmatprep.subr.mxu0 %v819_v0  ;;  %604 = vmatprep.subr.mxu1 %v819_v0  ;;  %v134_v12 = vld [vmem:[#allocation5 + $0x80] sm:$0xff]  ;;  %v133_v13 = vld [vmem:[#allocation5 + $0x78] sm:$0xff]  ;;  %v132_v14 = vld [vmem:[#allocation5 + $0x70] sm:$0xff]  ;;  %p790_p10 = scmp.ne.s32.totalorder %s500_s1, %s789_s21  ;;  %p795_p12 = scmp.lt.s32.totalorder %s789_s21, %s789_s21 }
  0x1f   :  { %592 = vmatpush3.msra.mxu0 %v42_v2  ;;  %605 = vmatpush3.msra.mxu1 %v138_v5  ;;  %v131_v15 = vld [vmem:[#allocation5 + $0x68] sm:$0xff]  ;;  %v130_v16 = vld [vmem:[#allocation5 + $0x60] sm:$0xff]  ;;  %v129_v17 = vld [vmem:[#allocation5 + $0x58] sm:$0xff] }
  0x20   :  { %593 = vmatprep.subr.mxu0 %v819_v0  ;;  %606 = vmatprep.subr.mxu1 %v819_v0  ;;  %v128_v18 = vld [vmem:[#allocation5 + $0x50] sm:$0xff]  ;;  %v127_v19 = vld [vmem:[#allocation5 + $0x48] sm:$0xff]  ;;  %v126_v20 = vld [vmem:[#allocation5 + $0x40] sm:$0xff]  ;;  %p796_p13 = por %p795_p12, %p794_p11 }
  0x21   :  { %594 = vmatpush3.msra.mxu0 %v41_v3  ;;  %607 = vmatpush3.msra.mxu1 %v137_v7  ;;  %v125_v21 = vld [vmem:[#allocation5 + $0x38] sm:$0xff]  ;;  %v124_v22 = vld [vmem:[#allocation5 + $0x30] sm:$0xff]  ;;  %v230_v24 = vld [vmem:[#allocation5 + $0x128] sm:$0xff] }
  0x22   :  { %595 = vmatprep.subr.mxu0 %v819_v0  ;;  %608 = vmatprep.subr.mxu1 %v819_v0  ;;  %v231_v23 = vld [vmem:[#allocation5 + $0x130] sm:$0xff]  ;;  %v229_v25 = vld [vmem:[#allocation5 + $0x120] sm:$0xff]  ;;  %v228_v26 = vld [vmem:[#allocation5 + $0x118] sm:$0xff]  ;;  %p797_p0 = pnand %p796_p13, %p790_p10 }
  0x23   :  { %596 = vmatpush3.msra.mxu0 %v40_v6  ;;  %609 = vmatpush3.msra.mxu1 %v136_v9  ;;  %v227_v27 = vld [vmem:[#allocation5 + $0x110] sm:$0xff]  ;;  %v226_v28 = vld [vmem:[#allocation5 + $0x108] sm:$0xff]  ;;  %v225_v29 = vld [vmem:[#allocation5 + $0x100] sm:$0xff] }
  0x24   :  { %597 = vmatprep.subr.mxu0 %v819_v0  ;;  %610 = vmatprep.subr.mxu1 %v819_v0  ;;  %v224_v30 = vld [vmem:[#allocation5 + $0xf8] sm:$0xff]  ;;  %v223_v31 = vld [vmem:[#allocation5 + $0xf0] sm:$0xff]  ;;  %v222_v32 = vld [vmem:[#allocation5 + $0xe8] sm:$0xff] }
  0x25   :  { %598 = vmatpush3.msra.mxu0 %v39_v8  ;;  %611 = vmatpush3.msra.mxu1 %v135_v11  ;;  %v221_v33 = vld [vmem:[#allocation5 + $0xe0] sm:$0xff]  ;;  %v220_v34 = vld [vmem:[#allocation5 + $0xd8] sm:$0xff]  ;;  %v219_v35 = vld [vmem:[#allocation5 + $0xd0] sm:$0xff] }
  0x26   :  { %600 = vmatmul.mubr.msk.f32.vlgmr.msra.gmra.mxu0 %vm49_vm1, %v38_v10  ;;  %637 = vmatprep.subr.mxu0 %v819_v0  ;;  %v509_v36 = vld [vmem:[#allocation5 + $0x28] ss:$0 sm:$0xff]  ;;  %v217_v42 = vld [vmem:[#allocation5 + $0xc0] sm:$0xff]  ;;  %v216_v43 = vld [vmem:[#allocation5 + $0xb8] sm:$0xff] }
  0x27   :  { %612 = vmatprep.subr.mxu1 %v819_v0  ;;  %669 = vmatprep.mubr.msk.f32.mxu0 %vm820_vm0, %v819_v0  ;;  %v218_v41 = vld [vmem:[#allocation5 + $0xc8] sm:$0xff]  ;;  %v323_v44 = vld [vmem:[#allocation5 + $0x1b8] sm:$0xff]  ;;  %v322_v45 = vld [vmem:[#allocation5 + $0x1b0] sm:$0xff] }
  0x28   :  { %613 = vmatpush3.msra.mxu1 %v134_v12  ;;  %638 = vmatpush3.msra.mxu0 %v231_v23  ;;  %v321_v46 = vld [vmem:[#allocation5 + $0x1a8] sm:$0xff]  ;;  %v320_v47 = vld [vmem:[#allocation5 + $0x1a0] sm:$0xff]  ;;  %v319_v48 = vld [vmem:[#allocation5 + $0x198] sm:$0xff] }
  0x29   :  { %614 = vmatprep.subr.mxu1 %v819_v0  ;;  %639 = vmatprep.subr.mxu0 %v819_v0  ;;  %v318_v49 = vld [vmem:[#allocation5 + $0x190] sm:$0xff]  ;;  %v317_v50 = vld [vmem:[#allocation5 + $0x188] sm:$0xff]  ;;  %v316_v51 = vld [vmem:[#allocation5 + $0x180] sm:$0xff] }
  0x2a   :  { %615 = vmatpush3.msra.mxu1 %v133_v13  ;;  %640 = vmatpush3.msra.mxu0 %v230_v24  ;;  %v315_v52 = vld [vmem:[#allocation5 + $0x178] sm:$0xff]  ;;  %v314_v53 = vld [vmem:[#allocation5 + $0x170] sm:$0xff]  ;;  %v313_v54 = vld [vmem:[#allocation5 + $0x168] sm:$0xff] }
  0x2b   :  { %616 = vmatprep.subr.mxu1 %v819_v0  ;;  %641 = vmatprep.subr.mxu0 %v819_v0  ;;  %v312_v55 = vld [vmem:[#allocation5 + $0x160] sm:$0xff]  ;;  %v311_v56 = vld [vmem:[#allocation5 + $0x158] sm:$0xff]  ;;  %v511_v57 = vld [vmem:[#allocation5 + $0xb0] ss:$0 sm:$0xff] }
  0x2c   :  { %617 = vmatpush3.msra.mxu1 %v132_v14  ;;  %642 = vmatpush3.msra.mxu0 %v229_v25  ;;  %v310_v62 = vld [vmem:[#allocation5 + $0x150] sm:$0xff]  ;;  %v309_v63 = vld [vmem:[#allocation5 + $0x148] sm:$0xff]  ;;  %v308_v1 = vld [vmem:[#allocation5 + $0x140] sm:$0xff] }
  0x2d   :  { %618 = vmatprep.subr.mxu1 %v819_v0  ;;  %643 = vmatprep.subr.mxu0 %v819_v0  ;;  %v415_v2 = vld [vmem:[#allocation5 + $0x240] sm:$0xff]  ;;  %v414_v3 = vld [vmem:[#allocation5 + $0x238] sm:$0xff]  ;;  %v413_v4 = vld [vmem:[#allocation5 + $0x230] sm:$0xff] }
  0x2e   :  { %619 = vmatpush3.msra.mxu1 %v131_v15  ;;  %644 = vmatpush3.msra.mxu0 %v228_v26  ;;  %v412_v5 = vld [vmem:[#allocation5 + $0x228] sm:$0xff]  ;;  %v411_v6 = vld [vmem:[#allocation5 + $0x220] sm:$0xff]  ;;  %v410_v7 = vld [vmem:[#allocation5 + $0x218] sm:$0xff] }
  0x2f   :  { %620 = vmatprep.subr.mxu1 %v819_v0  ;;  %645 = vmatprep.subr.mxu0 %v819_v0  ;;  %v409_v8 = vld [vmem:[#allocation5 + $0x210] sm:$0xff]  ;;  %v408_v9 = vld [vmem:[#allocation5 + $0x208] sm:$0xff]  ;;  %v407_v10 = vld [vmem:[#allocation5 + $0x200] sm:$0xff] }
  0x30   :  { %621 = vmatpush3.msra.mxu1 %v130_v16  ;;  %646 = vmatpush3.msra.mxu0 %v227_v27  ;;  %v406_v11 = vld [vmem:[#allocation5 + $0x1f8] sm:$0xff]  ;;  %v405_v12 = vld [vmem:[#allocation5 + $0x1f0] sm:$0xff]  ;;  %v404_v13 = vld [vmem:[#allocation5 + $0x1e8] sm:$0xff] }
  0x31   :  { %622 = vmatprep.subr.mxu1 %v819_v0  ;;  %647 = vmatprep.subr.mxu0 %v819_v0  ;;  %v403_v14 = vld [vmem:[#allocation5 + $0x1e0] sm:$0xff]  ;;  %v512_v15 = vld [vmem:[#allocation5 + $0x138] ss:$0 sm:$0xff] }
  0x32   :  { %623 = vmatpush3.msra.mxu1 %v129_v17  ;;  %648 = vmatpush3.msra.mxu0 %v226_v28  ;;  %v513_v23 = vld [vmem:[#allocation5 + $0x1c0] ss:$0 sm:$0xff]  ;;  %v514_v28 = vld [vmem:[#allocation5 + $0x248] ss:$0 sm:$0xff] }
  0x33   :  { %624 = vmatprep.subr.mxu1 %v819_v0  ;;  %649 = vmatprep.subr.mxu0 %v819_v0 }
  0x34   :  { %625 = vmatpush3.msra.mxu1 %v128_v18  ;;  %650 = vmatpush3.msra.mxu0 %v225_v29 }
  0x35   :  { %626 = vmatprep.subr.mxu1 %v819_v0  ;;  %651 = vmatprep.subr.mxu0 %v819_v0 }
  0x36   :  { %627 = vmatpush3.msra.mxu1 %v127_v19  ;;  %652 = vmatpush3.msra.mxu0 %v224_v30 }
  0x37   :  { %628 = vmatprep.subr.mxu1 %v819_v0  ;;  %653 = vmatprep.subr.mxu0 %v819_v0 }
  0x38   :  { %629 = vmatpush3.msra.mxu1 %v126_v20  ;;  %654 = vmatpush3.msra.mxu0 %v223_v31  ;;  %v402_v20 = vld [vmem:[#allocation5 + $0x1d8] sm:$0xff] }
  0x39   :  { %630 = vmatprep.subr.mxu1 %v819_v0  ;;  %655 = vmatprep.subr.mxu0 %v819_v0 }
  0x3a   :  { %631 = vmatpush3.msra.mxu1 %v125_v21  ;;  %656 = vmatpush3.msra.mxu0 %v222_v32  ;;  %v401_v21 = vld [vmem:[#allocation5 + $0x1d0] sm:$0xff] }
  0x3b   :  { %632 = vmatprep.subr.mxu1 %v819_v0  ;;  %657 = vmatprep.subr.mxu0 %v819_v0 }
  0x3c   :  { %633 = vmatpush3.msra.mxu1 %v124_v22  ;;  %658 = vmatpush3.msra.mxu0 %v221_v33  ;;  %v400_v22 = vld [vmem:[#allocation5 + $0x1c8] sm:$0xff] }
  0x3d   :  { %672 = vmatprep.subr.mxu1 %v819_v0  ;;  %659 = vmatprep.subr.mxu0 %v819_v0 }
  0x3e   :  { %660 = vmatpush3.msra.mxu0 %v220_v34 }
  0x3f   :  { %661 = vmatprep.subr.mxu0 %v819_v0 }
  0x40   :  { %662 = vmatpush3.msra.mxu0 %v219_v35 }
  0x41   :  { %663 = vmatprep.subr.mxu0 %v819_v0 }
  0x42   :  { %664 = vmatpush3.msra.mxu0 %v218_v41 }
  0x43   :  { %665 = vmatprep.subr.mxu0 %v819_v0 }
  0x44   :  { %666 = vmatpush3.msra.mxu0 %v217_v42 }
  0x45   :  { %667 = vmatprep.subr.mxu0 %v819_v0 }
  0x46   :  { %668 = vmatpush3.msra.mxu0 %v216_v43 }
  0x47   :  { %707 = vmatprep.subr.mxu0 %v819_v0 }
  0xe6   :  { %v119_v37 = vpop.f32.mrf.mxu0 }
  0xe7   :  { %v120_v38 = vadd.f32 %v509_v36, %v119_v37 }
  0xe8   :  { %v601_v39 = vpop.f32.mrf.mxu0 }
  0xe9   :  { %v123_v40 = vmax.f32 %v120_v38, 0.0 }
  0xeb   :  { %635 = vmatmul.mubr.f32.vlgmr.msra.gmra.mxu1 %v123_v40 }
  0xec   :  { %704 = vmatprep.mubr.msk.f32.mxu1 %vm820_vm0, %v819_v0  ;;  %673 = vmatpush3.msra.mxu1 %v323_v44 }
  0xed   :  { %674 = vmatprep.subr.mxu1 %v819_v0 }
  0xee   :  { %675 = vmatpush3.msra.mxu1 %v322_v45 }
  0xef   :  { %676 = vmatprep.subr.mxu1 %v819_v0 }
  0xf0   :  { %677 = vmatpush3.msra.mxu1 %v321_v46 }
  0xf1   :  { %678 = vmatprep.subr.mxu1 %v819_v0 }
  0xf2   :  { %679 = vmatpush3.msra.mxu1 %v320_v47 }
  0xf3   :  { %680 = vmatprep.subr.mxu1 %v819_v0 }
  0xf4   :  { %681 = vmatpush3.msra.mxu1 %v319_v48 }
  0xf5   :  { %682 = vmatprep.subr.mxu1 %v819_v0 }
  0xf6   :  { %683 = vmatpush3.msra.mxu1 %v318_v49 }
  0xf7   :  { %684 = vmatprep.subr.mxu1 %v819_v0 }
  0xf8   :  { %685 = vmatpush3.msra.mxu1 %v317_v50 }
  0xf9   :  { %686 = vmatprep.subr.mxu1 %v819_v0 }
  0xfa   :  { %687 = vmatpush3.msra.mxu1 %v316_v51 }
  0xfb   :  { %688 = vmatprep.subr.mxu1 %v819_v0 }
  0xfc   :  { %689 = vmatpush3.msra.mxu1 %v315_v52 }
  0xfd   :  { %690 = vmatprep.subr.mxu1 %v819_v0 }
  0xfe   :  { %691 = vmatpush3.msra.mxu1 %v314_v53 }
  0xff   :  { %692 = vmatprep.subr.mxu1 %v819_v0 }
 0x100   :  { %693 = vmatpush3.msra.mxu1 %v313_v54 }
 0x101   :  { %694 = vmatprep.subr.mxu1 %v819_v0 }
 0x102   :  { %695 = vmatpush3.msra.mxu1 %v312_v55 }
 0x103   :  { %696 = vmatprep.subr.mxu1 %v819_v0 }
 0x104   :  { %697 = vmatpush3.msra.mxu1 %v311_v56 }
 0x105   :  { %698 = vmatprep.subr.mxu1 %v819_v0 }
 0x106   :  { %699 = vmatpush3.msra.mxu1 %v310_v62 }
 0x107   :  { %700 = vmatprep.subr.mxu1 %v819_v0 }
 0x108   :  { %701 = vmatpush3.msra.mxu1 %v309_v63 }
 0x109   :  { %702 = vmatprep.subr.mxu1 %v819_v0 }
 0x10a   :  { %703 = vmatpush3.msra.mxu1 %v308_v1 }
 0x1ab   :  { %v211_v58 = vpop.f32.mrf.mxu1 }
 0x1ac   :  { %v212_v59 = vadd.f32 %v511_v57, %v211_v58 }
 0x1ad   :  { %v636_v60 = vpop.f32.mrf.mxu1 }
 0x1ae   :  { %v215_v61 = vmax.f32 %v212_v59, 0.0 }
 0x1b0   :  { %670 = vmatmul.mubr.f32.vlgmr.msra.gmra.mxu0 %v215_v61 }
 0x1b1   :  { %739 = vmatprep.mubr.msk.f32.mxu0 %vm820_vm0, %v819_v0  ;;  %708 = vmatpush3.msra.mxu0 %v415_v2 }
 0x1b2   :  { %709 = vmatprep.subr.mxu0 %v819_v0 }
 0x1b3   :  { %710 = vmatpush3.msra.mxu0 %v414_v3 }
 0x1b4   :  { %711 = vmatprep.subr.mxu0 %v819_v0 }
 0x1b5   :  { %712 = vmatpush3.msra.mxu0 %v413_v4 }
 0x1b6   :  { %713 = vmatprep.subr.mxu0 %v819_v0 }
 0x1b7   :  { %714 = vmatpush3.msra.mxu0 %v412_v5 }
 0x1b8   :  { %715 = vmatprep.subr.mxu0 %v819_v0 }
 0x1b9   :  { %716 = vmatpush3.msra.mxu0 %v411_v6 }
 0x1ba   :  { %717 = vmatprep.subr.mxu0 %v819_v0 }
 0x1bb   :  { %718 = vmatpush3.msra.mxu0 %v410_v7 }
 0x1bc   :  { %719 = vmatprep.subr.mxu0 %v819_v0 }
 0x1bd   :  { %720 = vmatpush3.msra.mxu0 %v409_v8 }
 0x1be   :  { %721 = vmatprep.subr.mxu0 %v819_v0 }
 0x1bf   :  { %722 = vmatpush3.msra.mxu0 %v408_v9 }
 0x1c0   :  { %723 = vmatprep.subr.mxu0 %v819_v0 }
 0x1c1   :  { %724 = vmatpush3.msra.mxu0 %v407_v10 }
 0x1c2   :  { %725 = vmatprep.subr.mxu0 %v819_v0 }
 0x1c3   :  { %726 = vmatpush3.msra.mxu0 %v406_v11 }
 0x1c4   :  { %727 = vmatprep.subr.mxu0 %v819_v0 }
 0x1c5   :  { %728 = vmatpush3.msra.mxu0 %v405_v12 }
 0x1c6   :  { %729 = vmatprep.subr.mxu0 %v819_v0 }
 0x1c7   :  { %730 = vmatpush3.msra.mxu0 %v404_v13 }
 0x1c8   :  { %731 = vmatprep.subr.mxu0 %v819_v0 }
 0x1c9   :  { %732 = vmatpush3.msra.mxu0 %v403_v14 }
 0x1ca   :  { %733 = vmatprep.subr.mxu0 %v819_v0 }
 0x1cb   :  { %734 = vmatpush3.msra.mxu0 %v402_v20 }
 0x1cc   :  { %735 = vmatprep.subr.mxu0 %v819_v0 }
 0x1cd   :  { %736 = vmatpush3.msra.mxu0 %v401_v21 }
 0x1ce   :  { %737 = vmatprep.subr.mxu0 %v819_v0 }
 0x1cf   :  { %738 = vmatpush3.msra.mxu0 %v400_v22 }
 0x270   :  { %v303_v16 = vpop.f32.mrf.mxu0 }
 0x271   :  { %v304_v17 = vadd.f32 %v512_v15, %v303_v16 }
 0x272   :  { %v671_v18 = vpop.f32.mrf.mxu0 }
 0x273   :  { %v307_v19 = vmax.f32 %v304_v17, 0.0 }
 0x275   :  { %705 = vmatmul.mubr.f32.vlgmr.msra.gmra.mxu1 %v307_v19 }
 0x335   :  { %v395_v24 = vpop.f32.mrf.mxu1 }
 0x336   :  { %v396_v25 = vadd.f32 %v513_v23, %v395_v24 }
 0x337   :  { %v706_v26 = vpop.f32.mrf.mxu1 }
 0x338   :  { %v399_v27 = vmax.f32 %v396_v25, 0.0 }
 0x33a   :  { %740 = vmatmul.mubr.f32.vlgmr.msra.gmra.mxu0 %v399_v27 }
 0x3fa   :  { %v487_v29 = vpop.f32.mrf.mxu0 }
 0x3fb   :  { %v488_v30 = vadd.f32 %v514_v28, %v487_v29 }
 0x3fc   :  { %v741_v31 = vpop.f32.mrf.mxu0 }
 0x3fd   :  { %492 = vst.msk [vmem:[#allocation7] sm:$0xff] %vm491_vm2, %v488_v30 }
 0x3fe   :  { %800 = shalt.err (!%p797_p0)
}
 0x3ff   :  { %502 = dma.vmem_to_hbm [thread:$0]  %s500_s1, 128, %s927_s2, [#allocation4]  }
 0x400   :  { %813 = dma.done.wait [#allocation4], 128  }
 0x401   :  { %814 = vsyncadd [#allocation4], 4294967168 }
 0x402   :  { %506 = vsyncpa [#allocation3], 1 }
 0x403   :  { %507 = vsyncpa [#allocation6], 1 }
 0x404   :  { %508 = vsyncpa [#allocation4], 1 }

</bundles_post_ra>
